<compile_context>
chip_gen: v5e
topology: v5e:2x2
jax: 0.10.0
libtpu: 0.0.40
codegen_flags: <defaults>
</compile_context>

<pallas_src>
import functools

import jax
import jax.numpy as jnp
from jax.experimental import pallas as pl
from jax.experimental.pallas import tpu as pltpu


def _round_up(x, m):
    return ((x + m - 1) // m) * m


def _pad2(a, rows, cols):
    r, c = a.shape
    if r == rows and c == cols:
        return a
    return jnp.pad(a, ((0, rows - r), (0, cols - c)))


def _residual_block_kernel(x_ref, w1_ref, b1_ref, w2_ref, b2_ref, o_ref, acc_ref,
                           *, compute_dtype):
    # Grid: (batch tiles, hidden-K tiles).  Shapes (padded, lane-dense):
    #   x_ref:  (TM, Dp) f32      -- same block for every K step
    #   w1_ref: (Dp, TK) compute  -- K-th column tile of W1
    #   b1_ref: (1, TK)  f32
    #   w2_ref: (TK, Dp) compute  -- K-th row tile of W2
    #   b2_ref: (1, Dp)  f32
    #   o_ref:  (TM, Dp)
    #   acc_ref:(TM, Dp) f32 scratch, accumulates the second matmul over K
    k = pl.program_id(1)

    @pl.when(k == 0)
    def _():
        acc_ref[...] = jnp.zeros_like(acc_ref)

    x = x_ref[...]                                   # f32, also used for the residual add
    xc = x.astype(compute_dtype)
    h = jnp.dot(xc, w1_ref[...], preferred_element_type=jnp.float32) + b1_ref[...]
    h = jnp.maximum(h, 0.0)                          # first ReLU (elementwise over hidden tile)
    acc_ref[...] += jnp.dot(h.astype(compute_dtype), w2_ref[...],
                            preferred_element_type=jnp.float32)

    @pl.when(k == pl.num_programs(1) - 1)
    def _():
        y = jnp.maximum(acc_ref[...] + b2_ref[...], 0.0)   # second ReLU
        o_ref[...] = (x + y).astype(o_ref.dtype)           # residual add in f32


def _vmem_footprint(tm, tk, dp, wbytes):
    weights = 2 * (dp * tk + tk * dp) * wbytes      # W1 + W2 tiles, double-buffered
    biases = 2 * (tk + dp) * 4
    io = 2 * (tm * dp * 4) * 2                      # x tile + out tile, double-buffered
    acc = tm * dp * 4                               # accumulator scratch
    inter = tm * tk * 4                             # first-layer activation
    return weights + biases + io + acc + inter


def residual_block(x, w1, b1, w2, b2, *, tm=None, tk=None,
                   compute_dtype=jnp.float32,
                   vmem_budget_bytes=40 * 1024 * 1024):
    """x: (B, D).  w1: (D, H) (PyTorch weight.T), b1: (H,), w2: (H, D), b2: (D,)."""
    B, D = x.shape
    H = w1.shape[1]
    assert w1.shape == (D, H) and w2.shape == (H, D)
    assert b1.shape == (H,) and b2.shape == (D,)

    # ---- lane-dense padding (features / hidden -> multiples of 128) ----
    Dp = _round_up(D, 128)
    Hp = _round_up(H, 128)

    # ---- tile selection (large batch tiles, capped by a VMEM budget) ----
    if tm is None:
        tm = min(256, _round_up(B, 8))
    tm = max(8, _round_up(tm, 8))
    if tk is None:
        tk = min(512, Hp)
    tk = min(max(128, _round_up(tk, 128)), Hp)

    wbytes = jnp.dtype(compute_dtype).itemsize
    while _vmem_footprint(tm, tk, Dp, wbytes) > vmem_budget_bytes and tm > 8:
        tm = max(8, _round_up(tm // 2, 8))
    while _vmem_footprint(tm, tk, Dp, wbytes) > vmem_budget_bytes and tk > 128:
        tk = max(128, _round_up(tk // 2, 128))

    Bp = _round_up(B, tm)

    # ---- wrapper-side zero padding (padded rows/cols provably produce zeros) ----
    x_p = _pad2(x, Bp, Dp)
    w1_p = _pad2(w1, Dp, Hp).astype(compute_dtype)
    w2_p = _pad2(w2, Hp, Dp).astype(compute_dtype)
    b1_p = _pad2(b1.reshape(1, H), 1, Hp)           # f32: added to f32 accumulators
    b2_p = _pad2(b2.reshape(1, D), 1, Dp)

    grid = (Bp // tm, Hp // tk)

    kernel = functools.partial(_residual_block_kernel, compute_dtype=compute_dtype)

    out_p = pl.pallas_call(
        kernel,
        out_shape=jax.ShapeDtypeStruct((Bp, Dp), x.dtype),
        grid_spec=pltpu.PrefetchScalarGridSpec(
            num_scalar_prefetch=0,
            grid=grid,
            in_specs=[
                pl.BlockSpec((tm, Dp), lambda i, k: (i, 0)),   # x tile (same across K)
                pl.BlockSpec((Dp, tk), lambda i, k: (0, k)),   # W1 column tile
                pl.BlockSpec((1, tk), lambda i, k: (0, k)),    # b1 tile
                pl.BlockSpec((tk, Dp), lambda i, k: (k, 0)),   # W2 row tile
                pl.BlockSpec((1, Dp), lambda i, k: (0, 0)),    # b2 (resident)
            ],
            out_specs=pl.BlockSpec((tm, Dp), lambda i, k: (i, 0)),
            scratch_shapes=[pltpu.VMEM((tm, Dp), jnp.float32)],
        ),
        compiler_params=pltpu.CompilerParams(
            dimension_semantics=("parallel", "arbitrary"),
            vmem_limit_bytes=48 * 1024 * 1024,
        ),
    )(x_p, w1_p, b1_p, w2_p, b2_p)

    return out_p[:B, :D]


def residual_block_ref(x, w1, b1, w2, b2):
    h = jnp.maximum(x @ w1 + b1, 0.0)
    y = jnp.maximum(h @ w2 + b2, 0.0)
    return x + y


if __name__ == "__main__":
    data_dim = 32
    hidden_dim = 64
    batch = 16

    key = jax.random.PRNGKey(0)
    kx, k1, kb1, k2, kb2 = jax.random.split(key, 5)

    x = jax.random.normal(kx, (batch, data_dim), dtype=jnp.float32)

    # Deterministic init mimicking nn.Linear's uniform(-1/sqrt(fan_in), 1/sqrt(fan_in)).
    lim1 = 1.0 / jnp.sqrt(data_dim)
    lim2 = 1.0 / jnp.sqrt(hidden_dim)
    # Stored pre-transposed: (in, out), i.e. PyTorch weight.T
    w1 = jax.random.uniform(k1, (data_dim, hidden_dim), jnp.float32, -lim1, lim1)
    b1 = jax.random.uniform(kb1, (hidden_dim,), jnp.float32, -lim1, lim1)
    w2 = jax.random.uniform(k2, (hidden_dim, data_dim), jnp.float32, -lim2, lim2)
    b2 = jax.random.uniform(kb2, (data_dim,), jnp.float32, -lim2, lim2)

    ref = residual_block_ref(x, w1, b1, w2, b2)

    # f32 compute path
    out = jax.block_until_ready(residual_block(x, w1, b1, w2, b2))
    assert out.shape == (batch, data_dim)
    assert jnp.allclose(out, ref, atol=1e-4, rtol=1e-4), "f32 mismatch vs reference"

    # bf16 weights/activations, f32 accumulation (v6e / v7x MXU fast path)
    out_bf16 = jax.block_until_ready(
        residual_block(x, w1, b1, w2, b2, compute_dtype=jnp.bfloat16))
    assert jnp.allclose(out_bf16, ref, atol=5e-2, rtol=5e-2), "bf16 mismatch vs reference"

    # ragged batch (exercises the cdiv-style padded grid instead of the old assert)
    xr = x[:5]
    out_r = jax.block_until_ready(residual_block(xr, w1, b1, w2, b2))
    assert out_r.shape == (5, data_dim)
    assert jnp.allclose(out_r, residual_block_ref(xr, w1, b1, w2, b2),
                        atol=1e-4, rtol=1e-4), "ragged-batch mismatch vs reference"

    print("KERNEL_OK")
</pallas_src>

<mosaic_0001>
module attributes {stable_mosaic.version = 11 : i64} {
  func.func @_residual_block_kernel(%arg0: i32, %arg1: i32, %arg2: memref<16x128xf32, #tpu.memory_space<vmem>>, %arg3: memref<128x128xf32, #tpu.memory_space<vmem>>, %arg4: memref<1x128xf32, #tpu.memory_space<vmem>>, %arg5: memref<128x128xf32, #tpu.memory_space<vmem>>, %arg6: memref<1x128xf32, #tpu.memory_space<vmem>>, %arg7: memref<16x128xf32, #tpu.memory_space<vmem>>, %arg8: memref<16x128xf32, #tpu.memory_space<vmem>>) attributes {dimension_semantics = [#tpu.dimension_semantics<parallel>, #tpu.dimension_semantics<arbitrary>], iteration_bounds = array<i64: 1, 1>, scalar_prefetch = 0 : i64, scratch_operands = 1 : i64, tpu.core_type = #tpu.core_type<tc>, window_params = [{transform_indices = @transform_0, window_bounds = array<i64: 16, 128>}, {transform_indices = @transform_1, window_bounds = array<i64: 128, 128>}, {transform_indices = @transform_2, window_bounds = array<i64: 1, 128>}, {transform_indices = @transform_3, window_bounds = array<i64: 128, 128>}, {pipeline_mode = #tpu.pipeline_mode<synchronous>, transform_indices = @transform_4, window_bounds = array<i64: 1, 128>}, {transform_indices = @transform_5, window_bounds = array<i64: 16, 128>}]} {
    %c0_i32 = arith.constant 0 : i32
    %0 = arith.cmpi eq, %arg1, %c0_i32 : i32
    %1 = arith.extui %0 : i1 to i32
    %c0_i32_0 = arith.constant 0 : i32
    %2 = arith.cmpi ne, %1, %c0_i32_0 : i32
    scf.if %2 {
      %cst_16 = arith.constant 0.000000e+00 : f32
      %19 = vector.broadcast %cst_16 : f32 to vector<16x128xf32>
      %c0_17 = arith.constant 0 : index
      %c0_18 = arith.constant 0 : index
      %20 = vector.load %arg8[%c0_17, %c0_18] : memref<16x128xf32, #tpu.memory_space<vmem>>, vector<16x128xf32>
      tpu.vector_store %arg8[%c0_17, %c0_18], %19 {strides = array<i32>} : memref<16x128xf32, #tpu.memory_space<vmem>>, vector<16x128xf32>,
    } else {
    }
    %c0 = arith.constant 0 : index
    %c0_1 = arith.constant 0 : index
    %3 = vector.load %arg2[%c0, %c0_1] : memref<16x128xf32, #tpu.memory_space<vmem>>, vector<16x128xf32>
    %c0_2 = arith.constant 0 : index
    %c0_3 = arith.constant 0 : index
    %4 = vector.load %arg3[%c0_2, %c0_3] : memref<128x128xf32, #tpu.memory_space<vmem>>, vector<128x128xf32>
    %cst = arith.constant dense<0.000000e+00> : vector<16x128xf32>
    %5 = tpu.matmul %3, %4, %cst {dimension_numbers = #tpu.dot_dimension_numbers<[1], [0], [0], [1], [0, 0, 1, 1], [], []>} : vector<16x128xf32>, vector<128x128xf32>, vector<16x128xf32> -> vector<16x128xf32>
    %c0_4 = arith.constant 0 : index
    %c0_5 = arith.constant 0 : index
    %6 = vector.load %arg4[%c0_4, %c0_5] : memref<1x128xf32, #tpu.memory_space<vmem>>, vector<1x128xf32>
    %7 = vector.broadcast %6 : vector<1x128xf32> to vector<16x128xf32>
    %8 = arith.addf %5, %7 : vector<16x128xf32>
    %cst_6 = arith.constant 0.000000e+00 : f32
    %9 = vector.broadcast %cst_6 : f32 to vector<16x128xf32>
    %10 = arith.maximumf %8, %9 : vector<16x128xf32>
    %c0_7 = arith.constant 0 : index
    %c0_8 = arith.constant 0 : index
    %11 = vector.load %arg8[%c0_7, %c0_8] : memref<16x128xf32, #tpu.memory_space<vmem>>, vector<16x128xf32>
    %c0_9 = arith.constant 0 : index
    %c0_10 = arith.constant 0 : index
    %12 = vector.load %arg5[%c0_9, %c0_10] : memref<128x128xf32, #tpu.memory_space<vmem>>, vector<128x128xf32>
    %cst_11 = arith.constant dense<0.000000e+00> : vector<16x128xf32>
    %13 = tpu.matmul %10, %12, %cst_11 {dimension_numbers = #tpu.dot_dimension_numbers<[1], [0], [0], [1], [0, 0, 1, 1], [], []>} : vector<16x128xf32>, vector<128x128xf32>, vector<16x128xf32> -> vector<16x128xf32>
    %14 = arith.addf %11, %13 : vector<16x128xf32>
    %c0_12 = arith.constant 0 : index
    %c0_13 = arith.constant 0 : index
    %15 = vector.load %arg8[%c0_12, %c0_13] : memref<16x128xf32, #tpu.memory_space<vmem>>, vector<16x128xf32>
    tpu.vector_store %arg8[%c0_12, %c0_13], %14 {strides = array<i32>} : memref<16x128xf32, #tpu.memory_space<vmem>>, vector<16x128xf32>,
    %c0_i32_14 = arith.constant 0 : i32
    %16 = arith.cmpi eq, %arg1, %c0_i32_14 : i32
    %17 = arith.extui %16 : i1 to i32
    %c0_i32_15 = arith.constant 0 : i32
    %18 = arith.cmpi ne, %17, %c0_i32_15 : i32
    scf.if %18 {
      %c0_16 = arith.constant 0 : index
      %c0_17 = arith.constant 0 : index
      %19 = vector.load %arg8[%c0_16, %c0_17] : memref<16x128xf32, #tpu.memory_space<vmem>>, vector<16x128xf32>
      %c0_18 = arith.constant 0 : index
      %c0_19 = arith.constant 0 : index
      %20 = vector.load %arg6[%c0_18, %c0_19] : memref<1x128xf32, #tpu.memory_space<vmem>>, vector<1x128xf32>
      %21 = vector.broadcast %20 : vector<1x128xf32> to vector<16x128xf32>
      %22 = arith.addf %19, %21 : vector<16x128xf32>
      %cst_20 = arith.constant 0.000000e+00 : f32
      %23 = vector.broadcast %cst_20 : f32 to vector<16x128xf32>
      %24 = arith.maximumf %22, %23 : vector<16x128xf32>
      %25 = arith.addf %3, %24 : vector<16x128xf32>
      %c0_21 = arith.constant 0 : index
      %c0_22 = arith.constant 0 : index
      %26 = vector.load %arg7[%c0_21, %c0_22] : memref<16x128xf32, #tpu.memory_space<vmem>>, vector<16x128xf32>
      tpu.vector_store %arg7[%c0_21, %c0_22], %25 {strides = array<i32>} : memref<16x128xf32, #tpu.memory_space<vmem>>, vector<16x128xf32>,
    } else {
    }
    return
  }
  func.func @transform_0(%arg0: i32, %arg1: i32) -> (i32, i32) {
    %c0_i32 = arith.constant 0 : i32
    %c0_i32_0 = arith.constant 0 : i32
    return %arg0, %c0_i32 : i32, i32
  }
  func.func @transform_1(%arg0: i32, %arg1: i32) -> (i32, i32) {
    %c0_i32 = arith.constant 0 : i32
    %c0_i32_0 = arith.constant 0 : i32
    return %c0_i32, %arg1 : i32, i32
  }
  func.func @transform_2(%arg0: i32, %arg1: i32) -> (i32, i32) {
    %c0_i32 = arith.constant 0 : i32
    %c0_i32_0 = arith.constant 0 : i32
    return %c0_i32, %arg1 : i32, i32
  }
  func.func @transform_3(%arg0: i32, %arg1: i32) -> (i32, i32) {
    %c0_i32 = arith.constant 0 : i32
    %c0_i32_0 = arith.constant 0 : i32
    return %arg1, %c0_i32 : i32, i32
  }
  func.func @transform_4(%arg0: i32, %arg1: i32) -> (i32, i32) {
    %c0_i32 = arith.constant 0 : i32
    %c0_i32_0 = arith.constant 0 : i32
    %c0_i32_1 = arith.constant 0 : i32
    return %c0_i32, %c0_i32_0 : i32, i32
  }
  func.func @transform_5(%arg0: i32, %arg1: i32) -> (i32, i32) {
    %c0_i32 = arith.constant 0 : i32
    %c0_i32_0 = arith.constant 0 : i32
    return %arg0, %c0_i32 : i32, i32
  }
}

</mosaic_0001>

<bundles_post_ra>
// kernel: tpu_custom_call.1
= control target key start
LH: loop header
LB: loop body
LE: loop exit
PB: predicated region body
PF: predicated region fallthrough
CT: control target
= control target key end

     0   :  { %10 = vsyncpa [#allocation4], 0  ;;  %s411_s0 = inlined_call_operand.hbm [shape: f32[16,128], index: 0, kind: input, shape index: {}]   ;;  %s412_s1 = inlined_call_operand.hbm [shape: f32[128,128], index: 1, kind: input, shape index: {}]   ;;  %s413_s2 = inlined_call_operand.vmem [shape: f32[1,128], index: 2, kind: input, shape index: {}]   ;;  %s414_s3 = inlined_call_operand.hbm [shape: f32[128,128], index: 3, kind: input, shape index: {}]   ;;  %s415_s4 = inlined_call_operand.vmem [shape: f32[1,128], index: 4, kind: input, shape index: {}]   ;;  %s416_s5 = inlined_call_operand.hbm [shape: f32[16,128], index: 5, kind: output, shape index: {}]  }
   0x1   :  { %11 = vsyncpa [#allocation7], 0 }
   0x2   :  { %12 = vsyncpa [#allocation5], 0  ;;  %s30_s20 = sshll.u32 %s412_s1, 4  ;;  %s345_s21 = smov [#allocation6]   ;;  %s31_s20 = int_to_ptr.hbm [resolvable:$true] %s30_s20 }
   0x3   :  { %s32_s22 = sshll.u32 %s345_s21, 4  ;;  %s17_s25 = sshll.u32 %s411_s0, 4  ;;  %s33_s22 = int_to_ptr.vmem [resolvable:$true] %s32_s22  ;;  %s18_s25 = int_to_ptr.hbm [resolvable:$true] %s17_s25 }
   0x4   :  { %s346_s26 = smov 128   ;;  %s347_s27 = smov 8  }
   0x5   :  { %38 = dma.hbm_to_vmem [thread:$0]  %s31_s20, 2048, %s33_s22, [#allocation7], %s346_s26, %s346_s26, %s347_s27  }
   0x6   :  { %s348_s28 = smov [#allocation3]   ;;  %s45_s1 = sshll.u32 %s414_s3, 4  ;;  %s46_s1 = int_to_ptr.hbm [resolvable:$true] %s45_s1 }
   0x7   :  { %s19_s29 = sshll.u32 %s348_s28, 4  ;;  %s349_s0 = smov [#allocation8]   ;;  %s20_s29 = int_to_ptr.vmem [resolvable:$true] %s19_s29 }
   0x8   :  { %25 = dma.hbm_to_vmem [thread:$0]  %s18_s25, 256, %s20_s29, [#allocation4], %s346_s26, %s346_s26, %s347_s27  }
   0x9   :  { %s47_s7 = sshll.u32 %s349_s0, 4  ;;  %s48_s7 = int_to_ptr.vmem [resolvable:$true] %s47_s7 }
   0xa   :  { %53 = dma.hbm_to_vmem [thread:$0]  %s46_s1, 2048, %s48_s7, [#allocation7], %s346_s26, %s346_s26, %s347_s27  }
   0xb   :  { %339 = dma.done.wait [#allocation4], 256  }
   0xc   :  { %340 = vsyncadd [#allocation4], 4294967040 }
   0xd   :  { %341 = dma.done.wait [#allocation7], 4096  }
   0xe   :  { %342 = vsyncadd [#allocation7], 4294963200  ;;  %v91_v0 = vld [vmem:[#allocation6 + $0x78] sm:$0xff]  ;;  %v90_v1 = vld [vmem:[#allocation6 + $0x70] sm:$0xff]  ;;  %s189_s14 = sshll.u32 %s416_s5, 4  ;;  %s190_s14 = int_to_ptr.hbm [resolvable:$true] %s189_s14 }
   0xf   :  { %203 = vmatpush.msra.mxu2 %v91_v0  ;;  %96 = vmatpush.msra.mxu0 %v91_v0  ;;  %v89_v2 = vld [vmem:[#allocation6 + $0x68] sm:$0xff]  ;;  %v88_v3 = vld [vmem:[#allocation6 + $0x60] sm:$0xff]  ;;  %v87_v4 = vld [vmem:[#allocation6 + $0x58] sm:$0xff] }
  0x10   :  { %v138_v5 = vld [vmem:[#allocation8 + $0x78] sm:$0xff]  ;;  %v137_v6 = vld [vmem:[#allocation8 + $0x70] sm:$0xff]  ;;  %v136_v8 = vld [vmem:[#allocation8 + $0x68] sm:$0xff] }
  0x11   :  { %204 = vmatpush.msra.mxu2 %v90_v1  ;;  %97 = vmatpush.msra.mxu0 %v90_v1  ;;  %v86_v7 = vld [vmem:[#allocation6 + $0x50] sm:$0xff]  ;;  %v85_v9 = vld [vmem:[#allocation6 + $0x48] sm:$0xff]  ;;  %v135_v10 = vld [vmem:[#allocation8 + $0x60] sm:$0xff] }
  0x12   :  { %219 = vmatpush.msra.mxu3 %v138_v5  ;;  %139 = vmatpush.msra.mxu1 %v138_v5  ;;  %v84_v11 = vld [vmem:[#allocation6 + $0x40] sm:$0xff]  ;;  %v134_v12 = vld [vmem:[#allocation8 + $0x58] sm:$0xff]  ;;  %v133_v14 = vld [vmem:[#allocation8 + $0x50] sm:$0xff] }
  0x13   :  { %205 = vmatpush.msra.mxu2 %v89_v2  ;;  %98 = vmatpush.msra.mxu0 %v89_v2  ;;  %v83_v13 = vld [vmem:[#allocation6 + $0x38] sm:$0xff]  ;;  %v82_v15 = vld [vmem:[#allocation6 + $0x30] sm:$0xff]  ;;  %v132_v16 = vld [vmem:[#allocation8 + $0x48] sm:$0xff] }
  0x14   :  { %220 = vmatpush.msra.mxu3 %v137_v6  ;;  %140 = vmatpush.msra.mxu1 %v137_v6  ;;  %v81_v17 = vld [vmem:[#allocation6 + $0x28] sm:$0xff]  ;;  %v131_v18 = vld [vmem:[#allocation8 + $0x40] sm:$0xff]  ;;  %v130_v20 = vld [vmem:[#allocation8 + $0x38] sm:$0xff] }
  0x15   :  { %206 = vmatpush.msra.mxu2 %v88_v3  ;;  %99 = vmatpush.msra.mxu0 %v88_v3  ;;  %v80_v19 = vld [vmem:[#allocation6 + $0x20] sm:$0xff]  ;;  %v79_v21 = vld [vmem:[#allocation6 + $0x18] sm:$0xff]  ;;  %v129_v22 = vld [vmem:[#allocation8 + $0x30] sm:$0xff] }
  0x16   :  { %221 = vmatpush.msra.mxu3 %v136_v8  ;;  %141 = vmatpush.msra.mxu1 %v136_v8  ;;  %v78_v23 = vld [vmem:[#allocation6 + $0x10] sm:$0xff]  ;;  %v128_v24 = vld [vmem:[#allocation8 + $0x28] sm:$0xff]  ;;  %v127_v26 = vld [vmem:[#allocation8 + $0x20] sm:$0xff] }
  0x17   :  { %207 = vmatpush.msra.mxu2 %v87_v4  ;;  %100 = vmatpush.msra.mxu0 %v87_v4  ;;  %v77_v25 = vld [vmem:[#allocation6 + $0x8] sm:$0xff]  ;;  %v76_v27 = vld [vmem:[#allocation6] sm:$0xff]  ;;  %v75_v28 = vld [vmem:[#allocation3 + $0x8] sm:$0xff] }
  0x18   :  { %222 = vmatpush.msra.mxu3 %v135_v10  ;;  %142 = vmatpush.msra.mxu1 %v135_v10  ;;  %v74_v29 = vld [vmem:[#allocation3] sm:$0xff]  ;;  %v126_v30 = vld [vmem:[#allocation8 + $0x18] sm:$0xff]  ;;  %v124_v32 = vld [vmem:[#allocation8 + $0x8] sm:$0xff] }
  0x19   :  { %208 = vmatpush.msra.mxu2 %v86_v7  ;;  %101 = vmatpush.msra.mxu0 %v86_v7  ;;  %v125_v31 = vld [vmem:[#allocation8 + $0x10] sm:$0xff]  ;;  %v123_v33 = vld [vmem:[#allocation8] sm:$0xff] }
  0x1a   :  { %223 = vmatpush.msra.mxu3 %v134_v12  ;;  %143 = vmatpush.msra.mxu1 %v134_v12  ;;  %v241_v34 = vld [vmem:[%s413_s2] ss:$0 sm:$0xff]  ;;  %s350_s2 = smov [#allocation9]  }
  0x1b   :  { %209 = vmatpush.msra.mxu2 %v85_v9  ;;  %102 = vmatpush.msra.mxu0 %v85_v9  ;;  %v242_v41 = vld [vmem:[%s415_s4] ss:$0 sm:$0xff]  ;;  %s187_s11 = sshll.u32 %s350_s2, 4  ;;  %s188_s11 = int_to_ptr.vmem [resolvable:$true] %s187_s11 }
  0x1c   :  { %224 = vmatpush.msra.mxu3 %v133_v14  ;;  %144 = vmatpush.msra.mxu1 %v133_v14 }
  0x1d   :  { %210 = vmatpush.msra.mxu2 %v84_v11  ;;  %103 = vmatpush.msra.mxu0 %v84_v11 }
  0x1e   :  { %225 = vmatpush.msra.mxu3 %v132_v16  ;;  %145 = vmatpush.msra.mxu1 %v132_v16 }
  0x1f   :  { %211 = vmatpush.msra.mxu2 %v83_v13  ;;  %104 = vmatpush.msra.mxu0 %v83_v13 }
  0x20   :  { %226 = vmatpush.msra.mxu3 %v131_v18  ;;  %146 = vmatpush.msra.mxu1 %v131_v18 }
  0x21   :  { %212 = vmatpush.msra.mxu2 %v82_v15  ;;  %105 = vmatpush.msra.mxu0 %v82_v15 }
  0x22   :  { %227 = vmatpush.msra.mxu3 %v130_v20  ;;  %147 = vmatpush.msra.mxu1 %v130_v20 }
  0x23   :  { %213 = vmatpush.msra.mxu2 %v81_v17  ;;  %106 = vmatpush.msra.mxu0 %v81_v17 }
  0x24   :  { %228 = vmatpush.msra.mxu3 %v129_v22  ;;  %148 = vmatpush.msra.mxu1 %v129_v22 }
  0x25   :  { %214 = vmatpush.msra.mxu2 %v80_v19  ;;  %107 = vmatpush.msra.mxu0 %v80_v19 }
  0x26   :  { %229 = vmatpush.msra.mxu3 %v128_v24  ;;  %149 = vmatpush.msra.mxu1 %v128_v24 }
  0x27   :  { %215 = vmatpush.msra.mxu2 %v79_v21  ;;  %108 = vmatpush.msra.mxu0 %v79_v21 }
  0x28   :  { %230 = vmatpush.msra.mxu3 %v127_v26  ;;  %150 = vmatpush.msra.mxu1 %v127_v26 }
  0x29   :  { %216 = vmatpush.msra.mxu2 %v78_v23  ;;  %109 = vmatpush.msra.mxu0 %v78_v23 }
  0x2a   :  { %231 = vmatpush.msra.mxu3 %v126_v30  ;;  %151 = vmatpush.msra.mxu1 %v126_v30 }
  0x2b   :  { %217 = vmatpush.msra.mxu2 %v77_v25  ;;  %110 = vmatpush.msra.mxu0 %v77_v25 }
  0x2c   :  { %232 = vmatpush.msra.mxu3 %v125_v31  ;;  %152 = vmatpush.msra.mxu1 %v125_v31 }
  0x2d   :  { %218 = vmatpush.msra.mxu2 %v76_v27  ;;  %111 = vmatpush.msra.mxu0 %v76_v27 }
  0x2e   :  { %115 = vmatmul.f32.vlgmr.msra.gmra.mxu2 %v75_v28  ;;  %112 = vmatmul.f32.vlgmr.msra.gmra.mxu0 %v74_v29 }
  0x2f   :  { %233 = vmatpush.msra.mxu3 %v124_v32  ;;  %153 = vmatpush.msra.mxu1 %v124_v32 }
  0x31   :  { %234 = vmatpush.msra.mxu3 %v123_v33  ;;  %154 = vmatpush.msra.mxu1 %v123_v33 }
  0xab   :  { %v113_v35 = vpop.f32.mrf.mxu0 }
  0xac   :  { %v114_v36 = vadd.f32 %v241_v34, %v113_v35 }
  0xae   :  { %v119_v37 = vmax.f32 %v114_v36, 0.0 }
  0xb0   :  { %155 = vmatmul.f32.vlgmr.msra.gmra.mxu1 %v119_v37 }
  0xb1   :  { %v116_v38 = vpop.f32.mrf.mxu2 }
  0xb2   :  { %v117_v39 = vadd.f32 %v241_v34, %v116_v38 }
  0xb4   :  { %v120_v40 = vmax.f32 %v117_v39, 0.0 }
  0xb6   :  { %158 = vmatmul.f32.vlgmr.msra.gmra.mxu3 %v120_v40 }
 0x12d   :  { %v156_v42 = vpop.f32.mrf.mxu1 }
 0x12e   :  { %v175_v43 = vadd.f32 %v242_v41, %v156_v42 }
 0x130   :  { %v177_v44 = vmax.f32 %v175_v43, 0.0 }
 0x132   :  { %v179_v45 = vadd.f32 %v177_v44, %v74_v29 }
 0x134   :  { %181 = vst [vmem:[#allocation9] sm:$0xff] %v179_v45 }
 0x139   :  { %v159_v46 = vpop.f32.mrf.mxu3 }
 0x13a   :  { %v176_v47 = vadd.f32 %v242_v41, %v159_v46 }
 0x13c   :  { %v178_v48 = vmax.f32 %v176_v47, 0.0 }
 0x13e   :  { %v180_v49 = vadd.f32 %v178_v48, %v75_v28 }
 0x140   :  { %182 = vst [vmem:[#allocation9 + $0x8] sm:$0xff] %v180_v49 }
 0x141   :  { %195 = dma.vmem_to_hbm [thread:$0]  %s188_s11, 256, %s190_s14, [#allocation5], %s346_s26, %s346_s26, %s347_s27  }
 0x142   :  { %343 = dma.done.wait [#allocation5], 256  }
 0x143   :  { %344 = vsyncadd [#allocation5], 4294967040 }
 0x144   :  { %200 = vsyncpa [#allocation4], 1 }
 0x145   :  { %201 = vsyncpa [#allocation7], 1 }
 0x146   :  { %202 = vsyncpa [#allocation5], 1 }

</bundles_post_ra>
